<compile_context>
chip_gen: v7x
topology: tpu7x:2x2x1
jax: 0.10.0
libtpu: 0.0.40
codegen_flags: <defaults>
</compile_context>

<pallas_src>
import functools

import jax
import jax.numpy as jnp
from jax.experimental import pallas as pl
from jax.experimental.pallas import tpu as pltpu

BN_EPS = 1e-5
LANE_TILE_MAX = 2048                 # per-tile lane width (samples per grid step)
RESIDENT_SLAB_BUDGET = 32 << 20      # keep x resident in VMEM if it fits this


def _round_up(n, m):
    return ((n + m - 1) // m) * m


def padded_batch(batch):
    """Lane tile and padded batch the kernel expects for a given true batch."""
    lane_tile = min(LANE_TILE_MAX, _round_up(batch, 128))
    b_pad = _round_up(batch, lane_tile)
    return b_pad, lane_tile


def _unpack_params(par):
    w1 = par[:, 0:4]        # [16, 4]  Linear(4,16).weight  (out, in)
    b1 = par[:, 4:5]        # [16, 1]  Linear(4,16).bias (cancels in train-BN)
    gamma = par[:, 5:6]     # [16, 1]  BatchNorm1d(16).weight
    beta = par[:, 6:7]      # [16, 1]  BatchNorm1d(16).bias
    w2 = par[:, 7:8]        # [16, 1]  Linear(16,1).weight
    b2 = par[0:1, 8:9]      # [1, 1]   Linear(16,1).bias
    return w1, b1, gamma, beta, w2, b2


def _centered_hidden(w1, x):
    # Linear(4,16) WITHOUT bias: hc = W1 @ x.  b1 cancels exactly inside the
    # train-mode BatchNorm (h - mean(h) == hc - mean(hc)), and zero-padded
    # lanes then contribute exactly 0 to the batch statistics.
    hc = w1[:, 0:1] * x[0:1, :]
    for k in range(1, 4):
        hc = hc + w1[:, k:k + 1] * x[k:k + 1, :]        # [16, T]
    return hc


def _output_from_hidden(hc, mean, rstd, gamma, beta, w2, b2):
    hn = (hc - mean) * rstd * gamma + beta              # BatchNorm1d(16)
    hr = jnp.maximum(hn, 0.0)                           # ReLU
    # Linear(16, 1): 16-sublane reduce (MXU pointless at K=16).
    o = jnp.sum(hr * w2, axis=0, keepdims=True) + b2    # [1, T]
    return jax.nn.sigmoid(o)                            # Sigmoid


def _meta_kernel_single(x_ref, par_ref, out_ref, *, batch):
    """Fast path: whole batch in one lane tile -> one grid step, no scratch."""
    w1, _, gamma, beta, w2, b2 = _unpack_params(par_ref[...])
    x = x_ref[...].astype(jnp.float32)                  # [4, T]
    hc = _centered_hidden(w1, x)                        # [16, T]

    inv_n = jnp.float32(1.0 / batch)
    s = jnp.sum(hc, axis=1, keepdims=True)              # [16, 1]
    sq = jnp.sum(hc * hc, axis=1, keepdims=True)        # [16, 1]
    mean = s * inv_n
    var = jnp.maximum(sq * inv_n - mean * mean, 0.0)    # clamp (cancellation guard)
    rstd = jax.lax.rsqrt(var + BN_EPS)

    out_ref[...] = _output_from_hidden(hc, mean, rstd, gamma, beta, w2, b2).astype(
        out_ref.dtype)


def _meta_kernel_multi(x_ref, par_ref, out_ref, sum_ref, sq_ref, *rest,
                       batch, resident):
    """Two-pass path (pass axis outer): pass 0 = whole-batch BN stats,
    pass 1 = normalize + Linear(16,1) + sigmoid, lane-dense store."""
    if resident:
        (x_slab,) = rest                                # [n_tiles, 4, lane_tile]

    p = pl.program_id(0)          # 0 = stats pass, 1 = output pass
    t = pl.program_id(1)          # batch tile index
    nt = pl.num_programs(1)

    w1, _, gamma, beta, w2, b2 = _unpack_params(par_ref[...])

    @pl.when(p == 0)
    def _stats_pass():
        x_raw = x_ref[...]
        if resident:
            x_slab[t] = x_raw                           # park tile in VMEM
        hc = _centered_hidden(w1, x_raw.astype(jnp.float32))

        @pl.when(t == 0)
        def _init():
            sum_ref[...] = jnp.zeros_like(sum_ref)
            sq_ref[...] = jnp.zeros_like(sq_ref)

        # Zero-padded lanes contribute exactly 0 (hc = W1 * 0): no mask needed.
        sum_ref[...] += jnp.sum(hc, axis=1, keepdims=True)      # [16, 1]
        sq_ref[...] += jnp.sum(hc * hc, axis=1, keepdims=True)  # [16, 1]

        @pl.when(t == nt - 1)
        def _finalize():
            inv_n = jnp.float32(1.0 / batch)
            mean = sum_ref[...] * inv_n
            var = jnp.maximum(sq_ref[...] * inv_n - mean * mean, 0.0)
            sum_ref[...] = mean
            sq_ref[...] = jax.lax.rsqrt(var + BN_EPS)
        # NOTE: pass 0 never writes out_ref; its out index_map pins block 0,
        # which pass 1 (t == 0) fully overwrites before it is ever flushed.

    @pl.when(p == 1)
    def _output_pass():
        if resident:
            x = x_slab[t].astype(jnp.float32)           # VMEM-resident copy
        else:
            x = x_ref[...].astype(jnp.float32)          # second HBM stream of x
        hc = _centered_hidden(w1, x)
        mean = sum_ref[...]                             # [16, 1]
        rstd = sq_ref[...]                              # [16, 1]
        out_ref[...] = _output_from_hidden(hc, mean, rstd, gamma, beta, w2,
                                           b2).astype(out_ref.dtype)


def stacking_meta_forward(feat_mat_t, packed_params, *, batch=None,
                          x_resident=None):
    """feat_mat_t: [4, B] (or [4, b_pad] pre-padded with zero lanes) float32,
    batch on lanes.  Returns ([B, 1] scores, None) like the PyTorch module."""
    f, b_in = feat_mat_t.shape
    assert f == 4 and packed_params.shape == (16, 128)
    if batch is None:
        batch = b_in
    b_pad, lane_tile = padded_batch(batch)
    n_tiles = b_pad // lane_tile

    if b_in == b_pad:
        x = feat_mat_t                  # caller pre-padded (pad lanes are zero)
    elif b_in == batch:
        # Fallback only: prefer padding at the gather (see build_feat_mat) so
        # this extra HBM copy of x never happens.
        x = jnp.pad(feat_mat_t, ((0, 0), (0, b_pad - batch)))
    else:
        raise ValueError(f"feat_mat_t has {b_in} lanes; expected {batch} or {b_pad}")

    if n_tiles == 1:
        # ---- single-pass fast path -------------------------------------
        out = pl.pallas_call(
            functools.partial(_meta_kernel_single, batch=batch),
            out_shape=jax.ShapeDtypeStruct((1, b_pad), jnp.float32),
            grid_spec=pltpu.PrefetchScalarGridSpec(
                num_scalar_prefetch=0,
                grid=(1,),
                in_specs=[
                    pl.BlockSpec((4, lane_tile), lambda i: (0, 0)),
                    pl.BlockSpec((16, 128), lambda i: (0, 0)),
                ],
                out_specs=pl.BlockSpec((1, lane_tile), lambda i: (0, 0)),
            ),
            compiler_params=pltpu.CompilerParams(
                dimension_semantics=("arbitrary",)),
        )(x, packed_params)
    else:
        # ---- two-pass path (stats, then normalize/output) ---------------
        slab_bytes = 4 * b_pad * x.dtype.itemsize
        if x_resident is None:
            x_resident = slab_bytes <= RESIDENT_SLAB_BUDGET

        scratch = [pltpu.VMEM((16, 1), jnp.float32),    # running sum   -> mean
                   pltpu.VMEM((16, 1), jnp.float32)]    # running sumsq -> rstd
        if x_resident:
            scratch.append(pltpu.VMEM((n_tiles, 4, lane_tile), x.dtype))
            # x index_map: stream every tile once in pass 0; pass 1 stays on the
            # last block so no new x DMAs are issued (reads come from the slab).
            x_map = lambda p, t: (0, (1 - p) * t + p * (n_tiles - 1))
            vmem_limit = int(slab_bytes) + (16 << 20)
        else:
            x_map = lambda p, t: (0, t)
            vmem_limit = None

        cp_kwargs = dict(dimension_semantics=("arbitrary", "arbitrary"))
        if vmem_limit is not None:
            cp_kwargs["vmem_limit_bytes"] = vmem_limit

        out = pl.pallas_call(
            functools.partial(_meta_kernel_multi, batch=batch,
                              resident=x_resident),
            out_shape=jax.ShapeDtypeStruct((1, b_pad), jnp.float32),
            grid_spec=pltpu.PrefetchScalarGridSpec(
                num_scalar_prefetch=0,
                grid=(2, n_tiles),      # (pass, batch-tile); pass axis outer
                in_specs=[
                    pl.BlockSpec((4, lane_tile), x_map),
                    # Packed params: same block every step -> one DMA, resident.
                    pl.BlockSpec((16, 128), lambda p, t: (0, 0)),
                ],
                # Pass 0 collapses onto block 0 (never written there), so each
                # output tile is DMA'd to HBM exactly once, in pass 1.
                out_specs=pl.BlockSpec((1, lane_tile), lambda p, t: (0, p * t)),
                scratch_shapes=scratch,
            ),
            # Both axes sequential: tile axis accumulates whole-batch BN stats
            # in shared VMEM scratch, so it must not be sharded across cores.
            compiler_params=pltpu.CompilerParams(**cp_kwargs),
        )(x, packed_params)

    # Lane-dense [1, b_pad] -> module's [B, 1] view.
    return out[:, :batch].reshape(batch, 1), None


def init_params(key):
    """Deterministic synthetic parameters matching the nn.Module shapes."""
    k1, k2, k3, k4 = jax.random.split(key, 4)
    w1 = jax.random.uniform(k1, (16, 4), jnp.float32, -0.5, 0.5)   # Linear(4,16).weight
    b1 = jax.random.uniform(k2, (16,), jnp.float32, -0.5, 0.5)     # Linear(4,16).bias
    gamma = jnp.ones((16,), jnp.float32)                           # BatchNorm1d(16).weight
    beta = jnp.zeros((16,), jnp.float32)                           # BatchNorm1d(16).bias
    w2 = jax.random.uniform(k3, (16,), jnp.float32, -0.25, 0.25)   # Linear(16,1).weight
    b2 = jax.random.uniform(k4, (), jnp.float32, -0.25, 0.25)      # Linear(16,1).bias
    return w1, b1, gamma, beta, w2, b2


def pack_params(w1, b1, gamma, beta, w2, b2):
    """Pack all six tensors (~129 floats) into one [16, 128] f32 tile (one DMA)."""
    packed = jnp.zeros((16, 128), jnp.float32)
    packed = packed.at[:, 0:4].set(w1)
    packed = packed.at[:, 4].set(b1)
    packed = packed.at[:, 5].set(gamma)
    packed = packed.at[:, 6].set(beta)
    packed = packed.at[:, 7].set(w2)
    packed = packed.at[0, 8].set(b2)
    return packed


def build_feat_mat(feat_table_t, head_ids, tail_ids, pad_to=None):
    """Glue equivalent of _build_feat_mat producing the kernel's [4, B] layout.
    With pad_to, the gather itself produces the zero-padded [4, pad_to] slab so
    the wrapper never needs a separate jnp.pad copy of x.
    TODO(synk): the host-side python-dict lookup in the PyTorch module has no
    Pallas equivalent; the dict is modeled as a dense table gathered with XLA."""
    b = head_ids.shape[0]
    if pad_to is None or pad_to == b:
        return feat_table_t[:, head_ids, tail_ids]              # [4, B]
    pad = pad_to - b
    h_ids = jnp.pad(head_ids, (0, pad))                         # cheap int32 pad
    t_ids = jnp.pad(tail_ids, (0, pad))
    feats = feat_table_t[:, h_ids, t_ids]                       # [4, pad_to]
    lane = jnp.arange(pad_to)
    return jnp.where(lane[None, :] < b, feats, 0.0)             # zero pad lanes


def _reference_forward(feat_mat_t, params):
    """Pure-JAX reference of the PyTorch forward (train-mode BN)."""
    w1, b1, gamma, beta, w2, b2 = params
    x = feat_mat_t.T                                    # [B, 4]
    h = x @ w1.T + b1                                   # [B, 16]
    mean = h.mean(axis=0)
    var = ((h - mean) ** 2).mean(axis=0)                # biased
    hn = (h - mean) / jnp.sqrt(var + BN_EPS) * gamma + beta
    hr = jnp.maximum(hn, 0.0)
    o = hr @ w2[:, None] + b2                           # [B, 1]
    return jax.nn.sigmoid(o)


if __name__ == "__main__":
    key = jax.random.PRNGKey(0)
    k_params, k_table, k_big = jax.random.split(key, 3)

    params = init_params(k_params)
    packed = pack_params(*params)

    # ---- Test 1: demo-sized batch (single-pass fast path) ----------------
    # Synthetic "feat_dict": dense table (head_id, tail_id) -> 4 features,
    # stored feature-major so the gather yields [4, B] directly.
    n_heads, n_tails = 6, 5
    feat_table_t = jax.random.normal(k_table, (4, n_heads, n_tails), jnp.float32)

    B = 8
    head_ids = jnp.arange(B, dtype=jnp.int32) % n_heads
    tail_ids = (jnp.arange(B, dtype=jnp.int32) * 3) % n_tails

    b_pad, _ = padded_batch(B)
    feat_mat_t = build_feat_mat(feat_table_t, head_ids, tail_ids, pad_to=b_pad)

    out, aux = stacking_meta_forward(feat_mat_t, packed, batch=B)
    out = jax.block_until_ready(out)

    assert out.shape == (B, 1) and aux is None
    assert bool(jnp.all(jnp.isfinite(out)))
    ref = _reference_forward(feat_mat_t[:, :B], params)
    assert jnp.allclose(out, ref, atol=2e-4, rtol=2e-4)

    # ---- Test 2: multi-tile path (ragged last tile), resident + streaming --
    B2 = 5000
    feat_big = jax.random.normal(k_big, (4, B2), jnp.float32)
    ref2 = _reference_forward(feat_big, params)

    out_res, _ = stacking_meta_forward(feat_big, packed)                    # VMEM-resident x
    out_str, _ = stacking_meta_forward(feat_big, packed, x_resident=False)  # streaming x
    out_res = jax.block_until_ready(out_res)
    out_str = jax.block_until_ready(out_str)

    assert out_res.shape == (B2, 1) and out_str.shape == (B2, 1)
    assert bool(jnp.all(jnp.isfinite(out_res)))
    assert bool(jnp.all(jnp.isfinite(out_str)))
    assert jnp.allclose(out_res, ref2, atol=2e-4, rtol=2e-4)
    assert jnp.allclose(out_str, ref2, atol=2e-4, rtol=2e-4)

    print("KERNEL_OK")
</pallas_src>

<mosaic_0001>
module attributes {stable_mosaic.version = 11 : i64} {
  func.func @_meta_kernel_single(%arg0: i32, %arg1: memref<4x128xf32, #tpu.memory_space<vmem>>, %arg2: memref<16x128xf32, #tpu.memory_space<vmem>>, %arg3: memref<1x128xf32, #tpu.memory_space<vmem>>) attributes {dimension_semantics = [#tpu.dimension_semantics<arbitrary>], iteration_bounds = array<i64: 1>, scalar_prefetch = 0 : i64, scratch_operands = 0 : i64, tpu.core_type = #tpu.core_type<tc>, window_params = [{pipeline_mode = #tpu.pipeline_mode<synchronous>, transform_indices = @transform_0, window_bounds = array<i64: 4, 128>}, {pipeline_mode = #tpu.pipeline_mode<synchronous>, transform_indices = @transform_1, window_bounds = array<i64: 16, 128>}, {pipeline_mode = #tpu.pipeline_mode<synchronous>, transform_indices = @transform_2, window_bounds = array<i64: 1, 128>}]} {
    %c0 = arith.constant 0 : index
    %c0_0 = arith.constant 0 : index
    %0 = vector.load %arg2[%c0, %c0_0] : memref<16x128xf32, #tpu.memory_space<vmem>>, vector<16x128xf32>
    %1 = vector.extract_strided_slice %0 {offsets = [0, 0], sizes = [16, 4], strides = [1, 1]} : vector<16x128xf32> to vector<16x4xf32>
    %2 = vector.extract_strided_slice %0 {offsets = [0, 5], sizes = [16, 1], strides = [1, 1]} : vector<16x128xf32> to vector<16x1xf32>
    %3 = vector.extract_strided_slice %0 {offsets = [0, 6], sizes = [16, 1], strides = [1, 1]} : vector<16x128xf32> to vector<16x1xf32>
    %4 = vector.extract_strided_slice %0 {offsets = [0, 7], sizes = [16, 1], strides = [1, 1]} : vector<16x128xf32> to vector<16x1xf32>
    %5 = vector.extract_strided_slice %0 {offsets = [0, 8], sizes = [1, 1], strides = [1, 1]} : vector<16x128xf32> to vector<1x1xf32>
    %c0_1 = arith.constant 0 : index
    %c0_2 = arith.constant 0 : index
    %6 = vector.load %arg1[%c0_1, %c0_2] : memref<4x128xf32, #tpu.memory_space<vmem>>, vector<4x128xf32>
    %7 = vector.extract_strided_slice %1 {offsets = [0, 0], sizes = [16, 1], strides = [1, 1]} : vector<16x4xf32> to vector<16x1xf32>
    %8 = vector.extract_strided_slice %6 {offsets = [0, 0], sizes = [1, 128], strides = [1, 1]} : vector<4x128xf32> to vector<1x128xf32>
    %9 = vector.broadcast %7 : vector<16x1xf32> to vector<16x128xf32>
    %10 = vector.broadcast %8 : vector<1x128xf32> to vector<16x128xf32>
    %11 = arith.mulf %9, %10 : vector<16x128xf32>
    %12 = vector.extract_strided_slice %1 {offsets = [0, 1], sizes = [16, 1], strides = [1, 1]} : vector<16x4xf32> to vector<16x1xf32>
    %13 = vector.extract_strided_slice %6 {offsets = [1, 0], sizes = [1, 128], strides = [1, 1]} : vector<4x128xf32> to vector<1x128xf32>
    %14 = vector.broadcast %12 : vector<16x1xf32> to vector<16x128xf32>
    %15 = vector.broadcast %13 : vector<1x128xf32> to vector<16x128xf32>
    %16 = arith.mulf %14, %15 : vector<16x128xf32>
    %17 = arith.addf %11, %16 : vector<16x128xf32>
    %18 = vector.extract_strided_slice %1 {offsets = [0, 2], sizes = [16, 1], strides = [1, 1]} : vector<16x4xf32> to vector<16x1xf32>
    %19 = vector.extract_strided_slice %6 {offsets = [2, 0], sizes = [1, 128], strides = [1, 1]} : vector<4x128xf32> to vector<1x128xf32>
    %20 = vector.broadcast %18 : vector<16x1xf32> to vector<16x128xf32>
    %21 = vector.broadcast %19 : vector<1x128xf32> to vector<16x128xf32>
    %22 = arith.mulf %20, %21 : vector<16x128xf32>
    %23 = arith.addf %17, %22 : vector<16x128xf32>
    %24 = vector.extract_strided_slice %1 {offsets = [0, 3], sizes = [16, 1], strides = [1, 1]} : vector<16x4xf32> to vector<16x1xf32>
    %25 = vector.extract_strided_slice %6 {offsets = [3, 0], sizes = [1, 128], strides = [1, 1]} : vector<4x128xf32> to vector<1x128xf32>
    %26 = vector.broadcast %24 : vector<16x1xf32> to vector<16x128xf32>
    %27 = vector.broadcast %25 : vector<1x128xf32> to vector<16x128xf32>
    %28 = arith.mulf %26, %27 : vector<16x128xf32>
    %29 = arith.addf %23, %28 : vector<16x128xf32>
    %cst = arith.constant dense<0.000000e+00> : vector<16xf32>
    %30 = vector.multi_reduction <add>, %29, %cst [1] : vector<16x128xf32> to vector<16xf32>
    %31 = vector.shape_cast %30 : vector<16xf32> to vector<16x1xf32>
    %32 = arith.mulf %29, %29 : vector<16x128xf32>
    %cst_3 = arith.constant dense<0.000000e+00> : vector<16xf32>
    %33 = vector.multi_reduction <add>, %32, %cst_3 [1] : vector<16x128xf32> to vector<16xf32>
    %34 = vector.shape_cast %33 : vector<16xf32> to vector<16x1xf32>
    %cst_4 = arith.constant 1.250000e-01 : f32
    %35 = vector.broadcast %cst_4 : f32 to vector<16x1xf32>
    %36 = arith.mulf %31, %35 : vector<16x1xf32>
    %cst_5 = arith.constant 1.250000e-01 : f32
    %37 = vector.broadcast %cst_5 : f32 to vector<16x1xf32>
    %38 = arith.mulf %34, %37 : vector<16x1xf32>
    %39 = arith.mulf %36, %36 : vector<16x1xf32>
    %40 = arith.subf %38, %39 : vector<16x1xf32>
    %cst_6 = arith.constant 0.000000e+00 : f32
    %41 = vector.broadcast %cst_6 : f32 to vector<16x1xf32>
    %42 = arith.maximumf %40, %41 : vector<16x1xf32>
    %cst_7 = arith.constant 9.99999974E-6 : f32
    %43 = vector.broadcast %cst_7 : f32 to vector<16x1xf32>
    %44 = arith.addf %42, %43 : vector<16x1xf32>
    %45 = math.rsqrt %44 : vector<16x1xf32>
    %46 = vector.broadcast %36 : vector<16x1xf32> to vector<16x128xf32>
    %47 = arith.subf %29, %46 : vector<16x128xf32>
    %48 = vector.broadcast %45 : vector<16x1xf32> to vector<16x128xf32>
    %49 = arith.mulf %47, %48 : vector<16x128xf32>
    %50 = vector.broadcast %2 : vector<16x1xf32> to vector<16x128xf32>
    %51 = arith.mulf %49, %50 : vector<16x128xf32>
    %52 = vector.broadcast %3 : vector<16x1xf32> to vector<16x128xf32>
    %53 = arith.addf %51, %52 : vector<16x128xf32>
    %cst_8 = arith.constant 0.000000e+00 : f32
    %54 = vector.broadcast %cst_8 : f32 to vector<16x128xf32>
    %55 = arith.maximumf %53, %54 : vector<16x128xf32>
    %56 = vector.broadcast %4 : vector<16x1xf32> to vector<16x128xf32>
    %57 = arith.mulf %55, %56 : vector<16x128xf32>
    %cst_9 = arith.constant dense<0.000000e+00> : vector<128xf32>
    %58 = vector.multi_reduction <add>, %57, %cst_9 [0] : vector<16x128xf32> to vector<128xf32>
    %59 = vector.shape_cast %58 : vector<128xf32> to vector<1x128xf32>
    %60 = vector.broadcast %5 : vector<1x1xf32> to vector<1x128xf32>
    %61 = arith.addf %59, %60 : vector<1x128xf32>
    %62 = arith.negf %61 : vector<1x128xf32>
    %63 = math.exp %62 : vector<1x128xf32>
    %cst_10 = arith.constant 1.000000e+00 : f32
    %64 = vector.broadcast %cst_10 : f32 to vector<1x128xf32>
    %65 = arith.addf %64, %63 : vector<1x128xf32>
    %66 = arith.divf %64, %65 : vector<1x128xf32>
    %c0_11 = arith.constant 0 : index
    %c0_12 = arith.constant 0 : index
    %67 = vector.load %arg3[%c0_11, %c0_12] : memref<1x128xf32, #tpu.memory_space<vmem>>, vector<1x128xf32>
    tpu.vector_store %arg3[%c0_11, %c0_12], %66 {strides = array<i32>} : memref<1x128xf32, #tpu.memory_space<vmem>>, vector<1x128xf32>,
    return
  }
  func.func @transform_0(%arg0: i32) -> (i32, i32) {
    %c0_i32 = arith.constant 0 : i32
    %c0_i32_0 = arith.constant 0 : i32
    %c0_i32_1 = arith.constant 0 : i32
    return %c0_i32, %c0_i32_0 : i32, i32
  }
  func.func @transform_1(%arg0: i32) -> (i32, i32) {
    %c0_i32 = arith.constant 0 : i32
    %c0_i32_0 = arith.constant 0 : i32
    %c0_i32_1 = arith.constant 0 : i32
    return %c0_i32, %c0_i32_0 : i32, i32
  }
  func.func @transform_2(%arg0: i32) -> (i32, i32) {
    %c0_i32 = arith.constant 0 : i32
    %c0_i32_0 = arith.constant 0 : i32
    %c0_i32_1 = arith.constant 0 : i32
    return %c0_i32, %c0_i32_0 : i32, i32
  }
}

</mosaic_0001>

<bundles_post_ra>
// kernel: tpu_custom_call.1
= control target key start
LH: loop header
LB: loop body
LE: loop exit
PB: predicated region body
PF: predicated region fallthrough
CT: control target
= control target key end

     0   :  { %7 = vsyncpa [#allocation3], 0  ;;  %s396_s0 = inlined_call_operand.hbm [shape: f32[4,128], index: 0, kind: input, shape index: {}]   ;;  %s397_s1 = inlined_call_operand.hbm [shape: f32[16,128], index: 1, kind: input, shape index: {}]   ;;  %s398_s2 = inlined_call_operand.hbm [shape: f32[1,128], index: 2, kind: output, shape index: {}]  }
   0x1   :  { %8 = vsyncpa [#allocation6], 0 }
   0x2   :  { %9 = vsyncpa [#allocation4], 0  ;;  %s306_s9 = smov [#allocation2]   ;;  %s307_s11 = smov [#allocation5]  }
   0x3   :  { %s16_s10 = sshll.u32 %s306_s9, 4  ;;  %s25_s12 = sshll.u32 %s307_s11, 4  ;;  %s17_s10 = int_to_ptr.vmem [resolvable:$true] %s16_s10  ;;  %s334_s12 = int_to_ptr.vmem [resolvable:$true] %s25_s12 }
   0x4   :  { %s234_s15 = scalar_lea.hbm %s396_s0, 64 }
   0x5   :  { %p235_p0 = scmp.ne.s32.totalorder %s396_s0, %s234_s15  ;;  %p238_p1 = scmp.lt.u32.totalorder %s234_s15, %s396_s0 }
   0x7   :  { %p240_p2 = pnand %p238_p1, %p235_p0 }
   0x9   :  { %243 = shalt.err (!%p240_p2)
}
   0xa   :  { %s244_s20 = scalar_lea.vmem %s17_s10, 64  ;;  %p249_p4 = scmp.lt.s32.totalorder %s17_s10, %s17_s10 }
   0xb   :  { %p245_p3 = scmp.ne.s32.totalorder %s17_s10, %s244_s20  ;;  %p250_p5 = scmp.lt.s32.totalorder %s244_s20, %s244_s20 }
   0xd   :  { %p251_p6 = por %p250_p5, %p249_p4 }
   0xf   :  { %p252_p7 = pnand %p251_p6, %p245_p3 }
  0x11   :  { %255 = shalt.err (!%p252_p7)
}
  0x12   :  { %19 = dma.hbm_to_vmem [thread:$0]  %s396_s0, 64, %s17_s10, [#allocation3]  }
  0x13   :  { %s256_s25 = scalar_lea.hbm %s397_s1, 256 }
  0x14   :  { %p257_p8 = scmp.ne.s32.totalorder %s397_s1, %s256_s25  ;;  %p260_p9 = scmp.lt.u32.totalorder %s256_s25, %s397_s1 }
  0x16   :  { %p262_p10 = pnand %p260_p9, %p257_p8 }
  0x18   :  { %265 = shalt.err (!%p262_p10)
}
  0x19   :  { %s266_s30 = scalar_lea.vmem %s334_s12, 256  ;;  %p271_p12 = scmp.lt.s32.totalorder %s334_s12, %s334_s12 }
  0x1a   :  { %p267_p11 = scmp.ne.s32.totalorder %s334_s12, %s266_s30  ;;  %p272_p13 = scmp.lt.s32.totalorder %s266_s30, %s266_s30 }
  0x1c   :  { %p273_p0 = por %p272_p13, %p271_p12 }
  0x1e   :  { %p274_p1 = pnand %p273_p0, %p267_p11 }
  0x20   :  { %277 = shalt.err (!%p274_p1)
}
  0x21   :  { %s308_s0 = smov 128   ;;  %s309_s3 = smov 8  }
  0x22   :  { %31 = dma.hbm_to_vmem [thread:$0]  %s397_s1, 256, %s334_s12, [#allocation6], %s308_s0, %s308_s0, %s309_s3  }
  0x23   :  { %300 = dma.done.wait [#allocation3], 64  }
  0x24   :  { %301 = vsyncadd [#allocation3], 4294967232 }
  0x25   :  { %302 = dma.done.wait [#allocation6], 256  }
  0x26   :  { %303 = vsyncadd [#allocation6], 4294967040  ;;  %v310_v0 = vmov 1   ;;  %v311_v1 = vmov 0   ;;  %v365_v2 = vld [vmem:[#allocation5] sm:$0xff]  ;;  %v369_v3 = vld [vmem:[#allocation5 + $0x8] sm:$0xff]  ;;  %v51_v8 = vlaneseq }
  0x27   :  { %215 = vset.pattern.permute.xlu1 %v310_v0  ;;  %214 = vset.pattern.permute.xlu0 %v311_v1  ;;  %v312_v4 = vmov 2   ;;  %v313_v5 = vmov 3   ;;  %v314_v6 = vmov 5   ;;  %v315_v7 = vmov 6   ;;  %v40_v14 = vld [vmem:[#allocation2] sm:$0xf] }
  0x28   :  { %58 = vperm.xlu1 %215, %v365_v2   ;;  %43 = vperm.xlu0 %214, %v365_v2   ;;  %v52_v9 = vshrl.u32 %v51_v8, 7  ;;  %v316_v43 = vmov 7   ;;  %v317_v44 = vmov 8   ;;  %s318_s1 = smov [#allocation7]  }
  0x29   :  { %s190_s6 = sshll.u32 %s318_s1, 4  ;;  %s191_s6 = int_to_ptr.vmem [resolvable:$true] %s190_s6 }
  0x2a   :  { %v67_v12 = vsub.s32 1, %v52_v9  ;;  %v53_v13 = vsub.s32 0, %v52_v9  ;;  %v83_v15 = vsub.s32 2, %v52_v9  ;;  %v99_v21 = vsub.s32 3, %v52_v9  ;;  %s278_s7 = scalar_lea.vmem %s191_s6, 16  ;;  %s282_s8 = scalar_lea.vmem %s191_s6, 32 }
  0x2b   :  { %p279_p2 = scmp.ne.s32.totalorder %s191_s6, %s278_s7  ;;  %p283_p3 = scmp.lt.s32.totalorder %s191_s6, %s191_s6 }
  0x2c   :  { %62 = vperm.xlu1 %215, %v369_v3   ;;  %48 = vperm.xlu0 %214, %v369_v3   ;;  %v68_v18 = vrot.slane %v40_v14, %v67_v12  ;;  %v54_v19 = vrot.slane %v40_v14, %v53_v13  ;;  %v84_v20 = vrot.slane %v40_v14, %v83_v15  ;;  %p284_p4 = scmp.lt.s32.totalorder %s282_s8, %s278_s7 }
  0x2d   :  { %v100_v30 = vrot.slane %v40_v14, %v99_v21 }
  0x2e   :  { %p285_p5 = por %p284_p4, %p283_p3 }
  0x30   :  { %217 = vset.pattern.permute.xlu1 %v312_v4  ;;  %216 = vset.pattern.permute.xlu0 %v312_v4  ;;  %p286_p6 = pnand %p285_p5, %p279_p2 }
  0x31   :  { %78 = vperm.xlu1 %217, %v369_v3   ;;  %74 = vperm.xlu0 %216, %v365_v2  }
  0x35   :  { %218 = vset.pattern.permute.xlu1 %v313_v5  ;;  %219 = vset.pattern.permute.xlu0 %v313_v5 }
  0x36   :  { %90 = vperm.xlu1 %218, %v365_v2   ;;  %94 = vperm.xlu0 %219, %v369_v3  }
  0x3a   :  { %220 = vset.pattern.permute.xlu1 %v314_v6  ;;  %221 = vset.pattern.permute.xlu0 %v314_v6 }
  0x3b   :  { %134 = vperm.xlu1 %220, %v365_v2  }
  0x3f   :  { %222 = vset.pattern.permute.xlu1 %v315_v7 }
  0xa7   :  { %v59_v10 = vpop.permute.xlu1 %58  ;;  %v44_v11 = vpop.permute.xlu0 %43 }
  0xa8   :  { %v69_v22 = vmul.f32 %v68_v18, %v59_v10  ;;  %v55_v23 = vmul.f32 %v54_v19, %v44_v11 }
  0xaa   :  { %v71_v31 = vadd.f32 %v69_v22, %v55_v23 }
  0xab   :  { %v63_v16 = vpop.permute.xlu1 %62  ;;  %v49_v17 = vpop.permute.xlu0 %48 }
  0xac   :  { %v70_v24 = vmul.f32 %v68_v18, %v63_v16  ;;  %v56_v25 = vmul.f32 %v54_v19, %v49_v17 }
  0xae   :  { %v72_v32 = vadd.f32 %v70_v24, %v56_v25 }
  0xb0   :  { %v79_v26 = vpop.permute.xlu1 %78  ;;  %v75_v27 = vpop.permute.xlu0 %74 }
  0xb1   :  { %v86_v28 = vmul.f32 %v84_v20, %v79_v26  ;;  %v85_v29 = vmul.f32 %v84_v20, %v75_v27 }
  0xb3   :  { %v88_v35 = vadd.f32 %v86_v28, %v72_v32  ;;  %v87_v36 = vadd.f32 %v85_v29, %v71_v31 }
  0xb5   :  { %v91_v33 = vpop.permute.xlu1 %90  ;;  %v95_v34 = vpop.permute.xlu0 %94 }
  0xb6   :  { %v101_v37 = vmul.f32 %v100_v30, %v91_v33  ;;  %v102_v38 = vmul.f32 %v100_v30, %v95_v34 }
  0xb8   :  { %v103_v39 = vadd.f32 %v101_v37, %v87_v36  ;;  %v104_v40 = vadd.f32 %v102_v38, %v88_v35 }
  0xba   :  { %105 = vadd.xlane.f32.xlu1 %v103_v39  ;;  %107 = vadd.xlane.f32.xlu0 %v104_v40  ;;  %v109_v41 = vmul.f32 %v103_v39, %v103_v39  ;;  %v110_v42 = vmul.f32 %v104_v40, %v104_v40  ;;  %v135_v45 = vpop.permute.xlu1 %134 }
  0xbe   :  { %111 = vadd.xlane.f32.xlu1 %v109_v41  ;;  %113 = vadd.xlane.f32.xlu0 %v110_v42 }
  0xcf   :  { %144 = vperm.xlu1 %222, %v365_v2  }
  0xd3   :  { %148 = vperm.xlu1 %222, %v369_v3  }
  0xd4   :  { %138 = vperm.xlu0 %221, %v369_v3  }
  0xd7   :  { %223 = vset.pattern.permute.xlu1 %v316_v43 }
  0xd8   :  { %156 = vperm.xlu1 %223, %v365_v2   ;;  %225 = vset.pattern.permute.xlu0 %v317_v44 }
  0xdc   :  { %160 = vperm.xlu1 %223, %v369_v3  }
  0xe0   :  { %224 = vset.pattern.permute.xlu1 %v317_v44 }
  0xe1   :  { %173 = vperm.xlu1 %224, %v365_v2  }
 0x147   :  { %v106_v46 = vpop.xlane.xlu1 %105  ;;  %v108_v47 = vpop.xlane.xlu0 %107 }
 0x148   :  { %v115_v48 = vmul.f32 0.125, %v106_v46  ;;  %v116_v49 = vmul.f32 0.125, %v108_v47 }
 0x14a   :  { %v119_v52 = vmul.f32 %v115_v48, %v115_v48  ;;  %v120_v53 = vmul.f32 %v116_v49, %v116_v49  ;;  %v129_v0 = vsub.f32 %v103_v39, %v115_v48  ;;  %v130_v2 = vsub.f32 %v104_v40, %v116_v49 }
 0x14b   :  { %v112_v50 = vpop.xlane.xlu1 %111  ;;  %v114_v51 = vpop.xlane.xlu0 %113 }
 0x14c   :  { %v117_v54 = vmul.f32 0.125, %v112_v50  ;;  %v118_v55 = vmul.f32 0.125, %v114_v51 }
 0x14e   :  { %v121_v56 = vsub.f32 %v117_v54, %v119_v52  ;;  %v122_v57 = vsub.f32 %v118_v55, %v120_v53 }
 0x14f   :  { %v145_v62 = vpop.permute.xlu1 %144 }
 0x150   :  { %v123_v58 = vmax.f32 %v121_v56, 0.0  ;;  %v124_v59 = vmax.f32 %v122_v57, 0.0 }
 0x152   :  { %v125_v60 = vadd.f32 1e-05, %v123_v58  ;;  %v126_v61 = vadd.f32 1e-05, %v124_v59 }
 0x153   :  { %v149_v63 = vpop.permute.xlu1 %148  ;;  %v139_v5 = vpop.permute.xlu0 %138 }
 0x154   :  { %226 = vrsqrt.f32 %v125_v60 }
 0x155   :  { %228 = vrsqrt.f32 %v126_v61 }
 0x157   :  { %v157_v8 = vpop.permute.xlu1 %156 }
 0x15b   :  { %v161_v15 = vpop.permute.xlu1 %160 }
 0x15e   :  { %v227_v1 = vpop.eup %226 }
 0x15f   :  { %v229_v3 = vpop.eup %228  ;;  %v131_v4 = vmul.f32 %v227_v1, %v129_v0 }
 0x160   :  { %v132_v6 = vmul.f32 %v229_v3, %v130_v2  ;;  %v174_v23 = vpop.permute.xlu1 %173 }
 0x161   :  { %v141_v7 = vmul.f32 %v135_v45, %v131_v4 }
 0x162   :  { %v142_v9 = vmul.f32 %v139_v5, %v132_v6 }
 0x163   :  { %v151_v10 = vadd.f32 %v145_v62, %v141_v7 }
 0x164   :  { %v152_v11 = vadd.f32 %v149_v63, %v142_v9 }
 0x165   :  { %v153_v12 = vmax.f32 %v151_v10, 0.0 }
 0x166   :  { %v154_v13 = vmax.f32 %v152_v11, 0.0 }
 0x167   :  { %v163_v14 = vmul.f32 %v157_v8, %v153_v12 }
 0x168   :  { %v164_v16 = vmul.f32 %v161_v15, %v154_v13 }
 0x16a   :  { %v165_v17 = vadd.f32 %v164_v16, %v163_v14 }
 0x16c   :  { %v166_v18 = vrot.slane %v165_v17, 4 }
 0x16e   :  { %v167_v19 = vadd.f32 %v166_v18, %v165_v17 }
 0x170   :  { %v168_v20 = vrot.slane %v167_v19, 2 }
 0x172   :  { %v169_v21 = vadd.f32 %v168_v20, %v167_v19 }
 0x174   :  { %v170_v22 = vrot.slane %v169_v21, 1 }
 0x176   :  { %v171_v24 = vadd.f32 %v170_v22, %v169_v21 }
 0x178   :  { %v176_v25 = vadd.f32 %v174_v23, %v171_v24 }
 0x17a   :  { %v200_v26 = vmul.f32 -1.442695, %v176_v25 }
 0x17c   :  { %230 = vpow2.f32 %v200_v26 }
 0x186   :  { %v231_v27 = vpop.eup %230 }
 0x187   :  { %v180_v28 = vadd.f32 1.0, %v231_v27 }
 0x189   :  { %232 = vrcp.f32 %v180_v28 }
 0x193   :  { %v233_v29 = vpop.eup %232 }
 0x194   :  { %183 = vst [vmem:[#allocation7] sm:$0x1] %v233_v29 }
 0x195   :  { %289 = shalt.err (!%p286_p6)
}
 0x196   :  { %s290_s11 = scalar_lea.hbm %s398_s2, 16 }
 0x197   :  { %p291_p7 = scmp.ne.s32.totalorder %s398_s2, %s290_s11  ;;  %p294_p8 = scmp.lt.u32.totalorder %s290_s11, %s398_s2 }
 0x199   :  { %p296_p9 = pnand %p294_p8, %p291_p7 }
 0x19b   :  { %299 = shalt.err (!%p296_p9)
}
 0x19c   :  { %193 = dma.vmem_to_hbm [thread:$0]  %s191_s6, 16, %s398_s2, [#allocation4]  }
 0x19d   :  { %304 = dma.done.wait [#allocation4], 16  }
 0x19e   :  { %305 = vsyncadd [#allocation4], 4294967280 }
 0x19f   :  { %197 = vsyncpa [#allocation3], 1 }
 0x1a0   :  { %198 = vsyncpa [#allocation6], 1 }
 0x1a1   :  { %199 = vsyncpa [#allocation4], 1 }

</bundles_post_ra>
